<compile_context>
chip_gen: v5e
topology: v5e:2x2
jax: 0.10.0
libtpu: 0.0.40
codegen_flags: <defaults>
</compile_context>

<pallas_src>
import math
from functools import partial

import jax
import jax.numpy as jnp
from jax.experimental import pallas as pl
from jax.experimental.pallas import tpu as pltpu


# ----------------------------------------------------------------------------
# Kernel
# ----------------------------------------------------------------------------
def _flash_attn_kernel(bias_ref, q_ref, k_ref, v_ref, o_ref,
                       m_sc, l_sc, acc_sc, *, scale):
    """One (batch, q-block, kv-block) grid step; all H heads at once."""
    kv_i = pl.program_id(2)

    @pl.when(kv_i == 0)
    def _init():
        m_sc[...] = jnp.full(m_sc.shape, -jnp.inf, dtype=jnp.float32)
        l_sc[...] = jnp.zeros(l_sc.shape, dtype=jnp.float32)
        acc_sc[...] = jnp.zeros(acc_sc.shape, dtype=jnp.float32)

    q = q_ref[0]            # (H, tq,  Dh)
    k = k_ref[0]            # (H, tkv, Dh)
    v = v_ref[0]            # (H, tkv, Dh)
    bias = bias_ref[...]    # (1, 1, tkv) additive mask bias; broadcasts over H, tq

    # Scores: contract the last dims of q and k directly (no K transpose),
    # f32 accumulation on the MXU even for bf16 inputs.
    s = jnp.einsum("hqd,hkd->hqk", q, k, preferred_element_type=jnp.float32)
    s = s * scale + bias                                    # (H, tq, tkv)

    # Online softmax update (never materializes the full (S, S) matrix).
    m_prev = m_sc[...]                                      # (H, tq, 1)
    m_new = jnp.maximum(m_prev, jnp.max(s, axis=-1, keepdims=True))
    alpha = jnp.exp(m_prev - m_new)
    p = jnp.exp(s - m_new)                                  # (H, tq, tkv)

    l_sc[...] = alpha * l_sc[...] + jnp.sum(p, axis=-1, keepdims=True)
    acc_sc[...] = alpha * acc_sc[...] + jnp.einsum(
        "hqk,hkd->hqd", p.astype(v.dtype), v, preferred_element_type=jnp.float32)
    m_sc[...] = m_new

    # TODO(synk): non-zero attention dropout (drop_attn) would need
    # pltpu.prng_seed / pltpu.prng_random_bits applied to `p`; dropout_prob=0.0 here.

    @pl.when(kv_i == pl.num_programs(2) - 1)
    def _finalize():
        inv_l = pl.reciprocal(l_sc[...], approx=True)       # EUP, not a VPU divide
        o_ref[0] = (acc_sc[...] * inv_l).astype(o_ref.dtype)


# ----------------------------------------------------------------------------
# Wrapper
# ----------------------------------------------------------------------------
def _pick_block(s):
    for b in (256, 128):
        if s % b == 0:
            return b
    return s


def softmax_attention(Q, K, V, mask, *, head_dim=None,
                      block_q=None, block_kv=None):
    """Pallas equivalent of SoftmaxAttention.forward(Q, K, V, mask)."""
    B, H, S, Dh = Q.shape
    if head_dim is None:
        head_dim = Dh
    scale = 1.0 / math.sqrt(head_dim)

    block_q = _pick_block(S) if block_q is None else block_q
    block_kv = _pick_block(S) if block_kv is None else block_kv
    assert S % block_q == 0 and S % block_kv == 0, "S must be divisible by blocks"

    # Fold the mask into one additive bias, computed once per call:
    #   dot - 1e6*(1 - mask)  ==  dot + (mask - 1)*1e6
    bias = ((mask.astype(jnp.float32) - 1.0) * 1000000.0).reshape(B, 1, S)

    grid = (B, S // block_q, S // block_kv)

    q_spec = pl.BlockSpec((1, H, block_q, Dh), lambda b, qi, ki: (b, 0, qi, 0))
    kv_spec = pl.BlockSpec((1, H, block_kv, Dh), lambda b, qi, ki: (b, 0, ki, 0))
    bias_spec = pl.BlockSpec((1, 1, block_kv), lambda b, qi, ki: (b, 0, ki))
    out_spec = pl.BlockSpec((1, H, block_q, Dh), lambda b, qi, ki: (b, 0, qi, 0))

    itemsize = Q.dtype.itemsize
    cost = pl.CostEstimate(
        flops=4 * B * H * S * S * Dh,                 # QK^T and PV matmuls
        transcendentals=B * H * S * S,                # exp
        bytes_accessed=int(4 * B * H * S * Dh * itemsize + bias.size * 4),
    )

    return pl.pallas_call(
        partial(_flash_attn_kernel, scale=scale),
        out_shape=jax.ShapeDtypeStruct((B, H, S, Dh), Q.dtype),
        grid_spec=pltpu.PrefetchScalarGridSpec(
            num_scalar_prefetch=0,
            grid=grid,
            in_specs=[bias_spec, q_spec, kv_spec, kv_spec],
            out_specs=out_spec,
            scratch_shapes=[
                pltpu.VMEM((H, block_q, 1), jnp.float32),    # running max  m
                pltpu.VMEM((H, block_q, 1), jnp.float32),    # running sum  l
                pltpu.VMEM((H, block_q, Dh), jnp.float32),   # output accumulator
            ],
        ),
        compiler_params=pltpu.CompilerParams(
            dimension_semantics=("parallel", "parallel", "arbitrary"),
            vmem_limit_bytes=32 * 1024 * 1024,
        ),
        cost_estimate=cost,
    )(bias, Q, K, V)


# ----------------------------------------------------------------------------
# Plain-JAX reference (matches the PyTorch forward)
# ----------------------------------------------------------------------------
def softmax_attention_reference(Q, K, V, mask, head_dim):
    Qf, Kf, Vf = (x.astype(jnp.float32) for x in (Q, K, V))
    dot = jnp.einsum("bhqd,bhkd->bhqk", Qf, Kf) / math.sqrt(head_dim)
    dot = dot - 1000000.0 * (1.0 - mask.astype(jnp.float32)[:, None, None, :])
    attn = jax.nn.softmax(dot, axis=-1)
    return jnp.einsum("bhqk,bhkd->bhqd", attn, Vf)


# ----------------------------------------------------------------------------
if __name__ == "__main__":
    # ---- case 1: tiny f32 problem, single KV block ---------------------------
    B, H, S, Dh = 2, 2, 16, 64
    kq, kk, kv = jax.random.split(jax.random.PRNGKey(0), 3)
    Q = jax.random.normal(kq, (B, H, S, Dh), dtype=jnp.float32)
    K = jax.random.normal(kk, (B, H, S, Dh), dtype=jnp.float32)
    V = jax.random.normal(kv, (B, H, S, Dh), dtype=jnp.float32)
    lengths = jnp.array([S, S - 5], dtype=jnp.int32)
    mask = (jnp.arange(S)[None, :] < lengths[:, None]).astype(jnp.float32)

    out = jax.block_until_ready(softmax_attention(Q, K, V, mask, head_dim=Dh))
    ref = softmax_attention_reference(Q, K, V, mask, Dh)
    assert out.shape == (B, H, S, Dh)
    assert jnp.allclose(out, ref, atol=5e-3, rtol=5e-3), "f32 single-block mismatch"

    # ---- case 2: longer sequence -> multi-block flash path (f32 and bf16) ----
    B, H, S, Dh = 2, 2, 256, 64
    kq2, kk2, kv2 = jax.random.split(jax.random.PRNGKey(1), 3)
    Q = jax.random.normal(kq2, (B, H, S, Dh), dtype=jnp.float32)
    K = jax.random.normal(kk2, (B, H, S, Dh), dtype=jnp.float32)
    V = jax.random.normal(kv2, (B, H, S, Dh), dtype=jnp.float32)
    lengths = jnp.array([S, S - 77], dtype=jnp.int32)
    mask = (jnp.arange(S)[None, :] < lengths[:, None]).astype(jnp.float32)

    out = jax.block_until_ready(softmax_attention(Q, K, V, mask, head_dim=Dh))
    ref = softmax_attention_reference(Q, K, V, mask, Dh)
    assert jnp.allclose(out, ref, atol=5e-3, rtol=5e-3), "f32 multi-block mismatch"

    # bf16 inputs: matmuls hit the MXU in bf16, accumulation stays f32 in-kernel.
    Qb, Kb, Vb = (x.astype(jnp.bfloat16) for x in (Q, K, V))
    out_b = jax.block_until_ready(softmax_attention(Qb, Kb, Vb, mask, head_dim=Dh))
    ref_b = softmax_attention_reference(Qb, Kb, Vb, mask, Dh)
    assert out_b.dtype == jnp.bfloat16
    assert jnp.allclose(out_b.astype(jnp.float32), ref_b, atol=6e-2, rtol=6e-2), \
        "bf16 mismatch"

    print("KERNEL_OK")
</pallas_src>

<mosaic_0001>
module attributes {stable_mosaic.version = 11 : i64} {
  func.func @_flash_attn_kernel(%arg0: i32, %arg1: i32, %arg2: i32, %arg3: memref<1x1x16xf32, #tpu.memory_space<vmem>>, %arg4: memref<1x2x16x64xf32, #tpu.memory_space<vmem>>, %arg5: memref<1x2x16x64xf32, #tpu.memory_space<vmem>>, %arg6: memref<1x2x16x64xf32, #tpu.memory_space<vmem>>, %arg7: memref<1x2x16x64xf32, #tpu.memory_space<vmem>>, %arg8: memref<2x16x1xf32, #tpu.memory_space<vmem>>, %arg9: memref<2x16x1xf32, #tpu.memory_space<vmem>>, %arg10: memref<2x16x64xf32, #tpu.memory_space<vmem>>) attributes {dimension_semantics = [#tpu.dimension_semantics<parallel>, #tpu.dimension_semantics<parallel>, #tpu.dimension_semantics<arbitrary>], iteration_bounds = array<i64: 2, 1, 1>, scalar_prefetch = 0 : i64, scratch_operands = 3 : i64, tpu.core_type = #tpu.core_type<tc>, window_params = [{transform_indices = @transform_0, window_bounds = array<i64: 1, 1, 16>}, {transform_indices = @transform_1, window_bounds = array<i64: 1, 2, 16, 64>}, {transform_indices = @transform_2, window_bounds = array<i64: 1, 2, 16, 64>}, {transform_indices = @transform_3, window_bounds = array<i64: 1, 2, 16, 64>}, {transform_indices = @transform_4, window_bounds = array<i64: 1, 2, 16, 64>}]} {
    %c0_i32 = arith.constant 0 : i32
    %0 = arith.cmpi eq, %arg2, %c0_i32 : i32
    %1 = arith.extui %0 : i1 to i32
    %c0_i32_0 = arith.constant 0 : i32
    %2 = arith.cmpi ne, %1, %c0_i32_0 : i32
    scf.if %2 {
      %cst_39 = arith.constant 0xFF800000 : f32
      %40 = vector.broadcast %cst_39 : f32 to vector<2x16x1xf32>
      %c0_40 = arith.constant 0 : index
      %c0_41 = arith.constant 0 : index
      %c0_42 = arith.constant 0 : index
      %41 = vector.load %arg8[%c0_40, %c0_41, %c0_42] : memref<2x16x1xf32, #tpu.memory_space<vmem>>, vector<2x16x1xf32>
      tpu.vector_store %arg8[%c0_40, %c0_41, %c0_42], %40 {strides = array<i32>} : memref<2x16x1xf32, #tpu.memory_space<vmem>>, vector<2x16x1xf32>,
      %cst_43 = arith.constant 0.000000e+00 : f32
      %42 = vector.broadcast %cst_43 : f32 to vector<2x16x1xf32>
      %c0_44 = arith.constant 0 : index
      %c0_45 = arith.constant 0 : index
      %c0_46 = arith.constant 0 : index
      %43 = vector.load %arg9[%c0_44, %c0_45, %c0_46] : memref<2x16x1xf32, #tpu.memory_space<vmem>>, vector<2x16x1xf32>
      tpu.vector_store %arg9[%c0_44, %c0_45, %c0_46], %42 {strides = array<i32>} : memref<2x16x1xf32, #tpu.memory_space<vmem>>, vector<2x16x1xf32>,
      %cst_47 = arith.constant 0.000000e+00 : f32
      %44 = vector.broadcast %cst_47 : f32 to vector<2x16x64xf32>
      %c0_48 = arith.constant 0 : index
      %c0_49 = arith.constant 0 : index
      %c0_50 = arith.constant 0 : index
      %45 = vector.load %arg10[%c0_48, %c0_49, %c0_50] : memref<2x16x64xf32, #tpu.memory_space<vmem>>, vector<2x16x64xf32>
      tpu.vector_store %arg10[%c0_48, %c0_49, %c0_50], %44 {strides = array<i32>} : memref<2x16x64xf32, #tpu.memory_space<vmem>>, vector<2x16x64xf32>,
    } else {
    }
    %c0 = arith.constant 0 : index
    %c0_1 = arith.constant 0 : index
    %c0_2 = arith.constant 0 : index
    %c0_3 = arith.constant 0 : index
    %3 = vector.load %arg4[%c0, %c0_1, %c0_2, %c0_3] : memref<1x2x16x64xf32, #tpu.memory_space<vmem>>, vector<1x2x16x64xf32>
    %4 = vector.shape_cast %3 : vector<1x2x16x64xf32> to vector<2x16x64xf32>
    %c0_4 = arith.constant 0 : index
    %c0_5 = arith.constant 0 : index
    %c0_6 = arith.constant 0 : index
    %c0_7 = arith.constant 0 : index
    %5 = vector.load %arg5[%c0_4, %c0_5, %c0_6, %c0_7] : memref<1x2x16x64xf32, #tpu.memory_space<vmem>>, vector<1x2x16x64xf32>
    %6 = vector.shape_cast %5 : vector<1x2x16x64xf32> to vector<2x16x64xf32>
    %c0_8 = arith.constant 0 : index
    %c0_9 = arith.constant 0 : index
    %c0_10 = arith.constant 0 : index
    %c0_11 = arith.constant 0 : index
    %7 = vector.load %arg6[%c0_8, %c0_9, %c0_10, %c0_11] : memref<1x2x16x64xf32, #tpu.memory_space<vmem>>, vector<1x2x16x64xf32>
    %8 = vector.shape_cast %7 : vector<1x2x16x64xf32> to vector<2x16x64xf32>
    %c0_12 = arith.constant 0 : index
    %c0_13 = arith.constant 0 : index
    %c0_14 = arith.constant 0 : index
    %9 = vector.load %arg3[%c0_12, %c0_13, %c0_14] : memref<1x1x16xf32, #tpu.memory_space<vmem>>, vector<1x1x16xf32>
    "tpu.trace_start"() <{level = 10 : i32, message = "hqd,hkd->hqk"}> : () -> ()
    %cst = arith.constant dense<0.000000e+00> : vector<2x16x16xf32>
    %10 = tpu.matmul %4, %6, %cst {dimension_numbers = #tpu.dot_dimension_numbers<[2], [2], [1], [1], [0, 0, 0, 1, 1, 1], [0], [0]>} : vector<2x16x64xf32>, vector<2x16x64xf32>, vector<2x16x16xf32> -> vector<2x16x16xf32>
    "tpu.trace_stop"() : () -> ()
    %cst_15 = arith.constant 1.250000e-01 : f32
    %11 = vector.broadcast %cst_15 : f32 to vector<2x16x16xf32>
    %12 = arith.mulf %10, %11 : vector<2x16x16xf32>
    %13 = vector.broadcast %9 : vector<1x1x16xf32> to vector<2x16x16xf32>
    %14 = arith.addf %12, %13 : vector<2x16x16xf32>
    %c0_16 = arith.constant 0 : index
    %c0_17 = arith.constant 0 : index
    %c0_18 = arith.constant 0 : index
    %15 = vector.load %arg8[%c0_16, %c0_17, %c0_18] : memref<2x16x1xf32, #tpu.memory_space<vmem>>, vector<2x16x1xf32>
    %cst_19 = arith.constant dense<0xFF800000> : vector<2x16xf32>
    %16 = vector.multi_reduction <maximumf>, %14, %cst_19 [2] : vector<2x16x16xf32> to vector<2x16xf32>
    %17 = vector.shape_cast %16 : vector<2x16xf32> to vector<2x16x1xf32>
    %18 = arith.maximumf %15, %17 : vector<2x16x1xf32>
    %19 = arith.subf %15, %18 : vector<2x16x1xf32>
    %20 = math.exp %19 : vector<2x16x1xf32>
    %21 = vector.broadcast %18 : vector<2x16x1xf32> to vector<2x16x16xf32>
    %22 = arith.subf %14, %21 : vector<2x16x16xf32>
    %23 = math.exp %22 : vector<2x16x16xf32>
    %c0_20 = arith.constant 0 : index
    %c0_21 = arith.constant 0 : index
    %c0_22 = arith.constant 0 : index
    %24 = vector.load %arg9[%c0_20, %c0_21, %c0_22] : memref<2x16x1xf32, #tpu.memory_space<vmem>>, vector<2x16x1xf32>
    %25 = arith.mulf %20, %24 : vector<2x16x1xf32>
    %cst_23 = arith.constant dense<0.000000e+00> : vector<2x16xf32>
    %26 = vector.multi_reduction <add>, %23, %cst_23 [2] : vector<2x16x16xf32> to vector<2x16xf32>
    %27 = vector.shape_cast %26 : vector<2x16xf32> to vector<2x16x1xf32>
    %28 = arith.addf %25, %27 : vector<2x16x1xf32>
    %c0_24 = arith.constant 0 : index
    %c0_25 = arith.constant 0 : index
    %c0_26 = arith.constant 0 : index
    %29 = vector.load %arg9[%c0_24, %c0_25, %c0_26] : memref<2x16x1xf32, #tpu.memory_space<vmem>>, vector<2x16x1xf32>
    tpu.vector_store %arg9[%c0_24, %c0_25, %c0_26], %28 {strides = array<i32>} : memref<2x16x1xf32, #tpu.memory_space<vmem>>, vector<2x16x1xf32>,
    %c0_27 = arith.constant 0 : index
    %c0_28 = arith.constant 0 : index
    %c0_29 = arith.constant 0 : index
    %30 = vector.load %arg10[%c0_27, %c0_28, %c0_29] : memref<2x16x64xf32, #tpu.memory_space<vmem>>, vector<2x16x64xf32>
    %31 = vector.broadcast %20 : vector<2x16x1xf32> to vector<2x16x64xf32>
    %32 = arith.mulf %31, %30 : vector<2x16x64xf32>
    "tpu.trace_start"() <{level = 10 : i32, message = "hqk,hkd->hqd"}> : () -> ()
    %cst_30 = arith.constant dense<0.000000e+00> : vector<2x16x64xf32>
    %33 = tpu.matmul %23, %8, %cst_30 {dimension_numbers = #tpu.dot_dimension_numbers<[2], [1], [1], [2], [0, 0, 0, 1, 1, 2], [0], [0]>} : vector<2x16x16xf32>, vector<2x16x64xf32>, vector<2x16x64xf32> -> vector<2x16x64xf32>
    "tpu.trace_stop"() : () -> ()
    %34 = arith.addf %32, %33 : vector<2x16x64xf32>
    %c0_31 = arith.constant 0 : index
    %c0_32 = arith.constant 0 : index
    %c0_33 = arith.constant 0 : index
    %35 = vector.load %arg10[%c0_31, %c0_32, %c0_33] : memref<2x16x64xf32, #tpu.memory_space<vmem>>, vector<2x16x64xf32>
    tpu.vector_store %arg10[%c0_31, %c0_32, %c0_33], %34 {strides = array<i32>} : memref<2x16x64xf32, #tpu.memory_space<vmem>>, vector<2x16x64xf32>,
    %c0_34 = arith.constant 0 : index
    %c0_35 = arith.constant 0 : index
    %c0_36 = arith.constant 0 : index
    %36 = vector.load %arg8[%c0_34, %c0_35, %c0_36] : memref<2x16x1xf32, #tpu.memory_space<vmem>>, vector<2x16x1xf32>
    tpu.vector_store %arg8[%c0_34, %c0_35, %c0_36], %18 {strides = array<i32>} : memref<2x16x1xf32, #tpu.memory_space<vmem>>, vector<2x16x1xf32>,
    %c0_i32_37 = arith.constant 0 : i32
    %37 = arith.cmpi eq, %arg2, %c0_i32_37 : i32
    %38 = arith.extui %37 : i1 to i32
    %c0_i32_38 = arith.constant 0 : i32
    %39 = arith.cmpi ne, %38, %c0_i32_38 : i32
    scf.if %39 {
      %c0_39 = arith.constant 0 : index
      %c0_40 = arith.constant 0 : index
      %c0_41 = arith.constant 0 : index
      %40 = vector.load %arg9[%c0_39, %c0_40, %c0_41] : memref<2x16x1xf32, #tpu.memory_space<vmem>>, vector<2x16x1xf32>
      %41 = tpu.reciprocal %40 {approx = true} : vector<2x16x1xf32> -> vector<2x16x1xf32>
      %c0_42 = arith.constant 0 : index
      %c0_43 = arith.constant 0 : index
      %c0_44 = arith.constant 0 : index
      %42 = vector.load %arg10[%c0_42, %c0_43, %c0_44] : memref<2x16x64xf32, #tpu.memory_space<vmem>>, vector<2x16x64xf32>
      %43 = vector.broadcast %41 : vector<2x16x1xf32> to vector<2x16x64xf32>
      %44 = arith.mulf %42, %43 : vector<2x16x64xf32>
      %c0_45 = arith.constant 0 : index
      %c0_46 = arith.constant 0 : index
      %c0_47 = arith.constant 0 : index
      %c0_48 = arith.constant 0 : index
      %45 = vector.load %arg7[%c0_45, %c0_46, %c0_47, %c0_48] : memref<1x2x16x64xf32, #tpu.memory_space<vmem>>, vector<1x2x16x64xf32>
      %46 = vector.shape_cast %45 : vector<1x2x16x64xf32> to vector<2x16x64xf32>
      %47 = vector.shape_cast %44 : vector<2x16x64xf32> to vector<1x2x16x64xf32>
      tpu.vector_store %arg7[%c0_45, %c0_46, %c0_47, %c0_48], %47 {strides = array<i32>} : memref<1x2x16x64xf32, #tpu.memory_space<vmem>>, vector<1x2x16x64xf32>,
    } else {
    }
    return
  }
  func.func @transform_0(%arg0: i32, %arg1: i32, %arg2: i32) -> (i32, i32, i32) {
    %c0_i32 = arith.constant 0 : i32
    %c0_i32_0 = arith.constant 0 : i32
    return %arg0, %c0_i32, %arg2 : i32, i32, i32
  }
  func.func @transform_1(%arg0: i32, %arg1: i32, %arg2: i32) -> (i32, i32, i32, i32) {
    %c0_i32 = arith.constant 0 : i32
    %c0_i32_0 = arith.constant 0 : i32
    %c0_i32_1 = arith.constant 0 : i32
    return %arg0, %c0_i32, %arg1, %c0_i32_0 : i32, i32, i32, i32
  }
  func.func @transform_2(%arg0: i32, %arg1: i32, %arg2: i32) -> (i32, i32, i32, i32) {
    %c0_i32 = arith.constant 0 : i32
    %c0_i32_0 = arith.constant 0 : i32
    %c0_i32_1 = arith.constant 0 : i32
    return %arg0, %c0_i32, %arg2, %c0_i32_0 : i32, i32, i32, i32
  }
  func.func @transform_3(%arg0: i32, %arg1: i32, %arg2: i32) -> (i32, i32, i32, i32) {
    %c0_i32 = arith.constant 0 : i32
    %c0_i32_0 = arith.constant 0 : i32
    %c0_i32_1 = arith.constant 0 : i32
    return %arg0, %c0_i32, %arg2, %c0_i32_0 : i32, i32, i32, i32
  }
  func.func @transform_4(%arg0: i32, %arg1: i32, %arg2: i32) -> (i32, i32, i32, i32) {
    %c0_i32 = arith.constant 0 : i32
    %c0_i32_0 = arith.constant 0 : i32
    %c0_i32_1 = arith.constant 0 : i32
    return %arg0, %c0_i32, %arg1, %c0_i32_0 : i32, i32, i32, i32
  }
}

</mosaic_0001>

<bundles_post_ra>
// kernel: tpu_custom_call.1
= control target key start
LH: loop header
LB: loop body
LE: loop exit
PB: predicated region body
PF: predicated region fallthrough
CT: control target
= control target key end

     0   :  { %s1565_s0 = inlined_call_operand.hbm [shape: f32[2,1,16], index: 0, kind: input, shape index: {}]   ;;  %s1566_s1 = inlined_call_operand.hbm [shape: f32[2,2,16,64], index: 1, kind: input, shape index: {}]   ;;  %s1567_s2 = inlined_call_operand.hbm [shape: f32[2,2,16,64], index: 2, kind: input, shape index: {}]   ;;  %s1568_s3 = inlined_call_operand.hbm [shape: f32[2,2,16,64], index: 3, kind: input, shape index: {}]   ;;  %s1569_s4 = inlined_call_operand.hbm [shape: f32[2,2,16,64], index: 4, kind: output, shape index: {}]  }
   0x1   :  { %1579 = sst [smem:[#allocation23_spill]] %s1565_s0 }
   0x2   :  { %1580 = sst [smem:[#allocation24_spill]] %s1566_s1 }
   0x3   :  { %9 = vsyncpa [#allocation6], 0 }
   0x4   :  { %11 = vsyncpa [#allocation6 + $0x1], 0 }
   0x5   :  { %12 = vsyncpa [#allocation9], 0 }
   0x6   :  { %14 = vsyncpa [#allocation9 + $0x1], 0 }
   0x7   :  { %15 = vsyncpa [#allocation12], 0 }
   0x8   :  { %17 = vsyncpa [#allocation12 + $0x1], 0 }
   0x9   :  { %18 = vsyncpa [#allocation7], 0 }
   0xa   :  { %20 = vsyncpa [#allocation7 + $0x1], 0  ;;  %s1294_s15 = smov 0   ;;  %s1296_s16 = smov 0  }
   0xb   :  { %s1298_s17 = smov 0   ;;  %s1300_s18 = smov 0  }
   0xc   :  { %s1302_s19 = smov 0   ;;  %s1304_s20 = smov 0  }
   0xd LB: > { %1581 = sst [smem:[#allocation18_spill]] %s1248_s17  ;;  %s1325_s21 = sadd.s32 4294967295, %s1260_s20   ;;  %s1260_s20 = sphi %s1304_s20, %s26_s20   ;;  %s1256_s19 = sphi %s1302_s19, %s1600_s19   ;;  %s1252_s18 = sphi %s1300_s18, %s1599_s18   ;;  %s1248_s17 = sphi %s1298_s17, %s1598_s17   ;;  %s1244_s16 = sphi %s1296_s16, %s1602_s16   ;;  %s1240_s15 = sphi %s1294_s15, %s1601_s15  }
   0xe   : > { %1582 = sst [smem:[#allocation19_spill]] %s1256_s19  ;;  %s900_s22 = sadd.s32 4294967294, %s1260_s20  }
   0xf   : > { %1583 = sst [smem:[#allocation20_spill]] %s1260_s20  ;;  %s45_s23 = sadd.s32 1, %s1256_s19 }
  0x10   : > { %s54_s24 = sadd.s32 1, %s1248_s17  ;;  %p47_p0 = scmp.ge.s32.totalorder %s45_s23, 2 }
  0x11   : > { %p61_p1 = scmp.ne.s32.totalorder %s1248_s17, %s1244_s16  ;;  %p62_p2 = scmp.eq.s32.totalorder %s1260_s20, 0 }
  0x12   : > { %p67_p3 = scmp.ne.s32.totalorder %s1244_s16, %s1240_s15  ;;  %s1604_s23 = smov (%p47_p0, %s45_s23), 0 }
  0x13   : > { %1584 = sst [smem:[#allocation21_spill]] %s1604_s23  ;;  %p1337_p4 = por %p62_p2, %p61_p1 }
  0x14   : > { %p68_p5 = scmp.eq.s32.totalorder %s1325_s21, 0  ;;  %s49_s26 = ssub.s32 %s1256_s19, %s1604_s23 }
  0x15   : > { %p177_p6 = scmp.eq.s32.totalorder %s1325_s21, 1  ;;  %p52_p7 = scmp.eq.s32.totalorder %s49_s26, 0 }
  0x16   : > { %p1345_p8 = por %p68_p5, %p67_p3  ;;  %p183_p10 = scmp.eq.s32.totalorder %s900_s22, 1 }
  0x17   : > { %p1349_p9 = por %p177_p6, %p61_p1  ;;  %p902_p12 = scmp.ge.s32.totalorder %s1260_s20, 2 }
  0x18   : > { %s1354_s29 = scalar_select %p52_p7, %s1248_s17, %s54_s24  }
  0x19   : > { %p1356_p11 = por %p183_p10, %p67_p3  ;;  %p965_p13 = scmp.lt.s32.totalorder %s1260_s20, 2 }
  0x1a   : > { %1588 = sst [smem:[#allocation22_spill]] %s1354_s29  ;;  %s1363_s5 = sand.u32 1, %s1248_s17  }
  0x1b   : > { %s221_s6 = sand.u32 1, %s1260_s20   ;;  %s1367_s7 = sshll.u32 %s1363_s5, 5 }
  0x1c   : > { %p1371_p0 = pnand %p965_p13, %p1337_p4  ;;  %s1376_s9 = sshll.u32 %s1256_s19, 5 }
  0x1d   : > { %s1591_s1 = sld [smem:[#allocation24_spill]]  ;;  %s225_s14 = scalar_lea.vmem [#allocation8], %s1367_s7 }
  0x1e   : > { %s235_s22 = sshll.u32 %s225_s14, 4  ;;  %s222_s24 = scalar_lea.sflag [#allocation9], %s221_s6  ;;  %s236_s22 = int_to_ptr.vmem [resolvable:$true] %s235_s22 }
  0x1f   : > { %s1571_s25 = smov 128   ;;  %s1573_s26 = smov 8  }
  0x20   : > { %p912_p1 = scmp.ge.s32.totalorder %s1260_s20, 1  ;;  %p291_p2 = scmp.lt.s32.totalorder %s1260_s20, 3 }
  0x21   : > { %s1593_s0 = sld [smem:[#allocation23_spill]]  ;;  %s249_s17 = scalar_lea.vmem [#allocation10], %s1367_s7 }
  0x22   : > { %p1390_p3 = pnand %p912_p1, %p291_p2  ;;  %s259_s11 = sshll.u32 %s249_s17, 4  ;;  %s260_s11 = int_to_ptr.vmem [resolvable:$true] %s259_s11 }
  0x23   : > { %s232_s12 = scalar_lea.hbm %s1591_s1, %s1376_s9  ;;  %s206_s1 = scalar_lea.vmem [#allocation5], %s1363_s5 }
  0x24   : > { %s233_s13 = sshll.u32 %s232_s12, 4  ;;  %s214_s23 = sshll.u32 %s206_s1, 4  ;;  %s234_s13 = int_to_ptr.hbm [resolvable:$true] %s233_s13  ;;  %s215_s23 = int_to_ptr.vmem [resolvable:$true] %s214_s23 }
  0x25   : > { %954 = dma.hbm_to_vmem [thread:$0]  (!%p1371_p0), %s234_s13, 512, %s236_s22, %s222_s24, %s1571_s25, %s1571_s25, %s1573_s26  }
  0x26   : > { %s204_s13 = scalar_lea.sflag [#allocation6], %s1363_s5  ;;  %s256_s26 = scalar_lea.hbm %s1567_s2, %s1376_s9 }
  0x27   : > { %s210_s6 = scalar_lea.hbm %s1593_s0, %s1256_s19  ;;  %s257_s29 = sshll.u32 %s256_s26, 4  ;;  %s258_s29 = int_to_ptr.hbm [resolvable:$true] %s257_s29 }
  0x28   : > { %s212_s14 = sshll.u32 %s210_s6, 4  ;;  %s1594_s12 = smov 8   ;;  %s213_s14 = int_to_ptr.hbm [resolvable:$true] %s212_s14 }
  0x29   : > { %951 = dma.hbm_to_vmem [thread:$0]  (!%p1371_p0), %s213_s14, 16, %s215_s23, %s204_s13  }
  0x2a   : > { %s1595_s6 = smov 128   ;;  %s280_s19 = scalar_lea.hbm %s1568_s3, %s1376_s9 }
  0x2b   : > { %957 = dma.hbm_to_vmem [thread:$0]  (!%p1371_p0), %s258_s29, 512, %s260_s11, %s222_s24, %s1595_s6, %s1595_s6, %s1594_s12  }
  0x2c   : > { %s273_s20 = scalar_lea.vmem [#allocation11], %s1367_s7  ;;  %s281_s14 = sshll.u32 %s280_s19, 4  ;;  %s282_s14 = int_to_ptr.hbm [resolvable:$true] %s281_s14 }
  0x2d   : > { %s283_s23 = sshll.u32 %s273_s20, 4  ;;  %s270_s25 = scalar_lea.sflag [#allocation12], %s1363_s5  ;;  %s284_s23 = int_to_ptr.vmem [resolvable:$true] %s283_s23 }
  0x2e   : > { %960 = dma.hbm_to_vmem [thread:$0]  (!%p1371_p0), %s282_s14, 512, %s284_s23, %s270_s25, %s1595_s6, %s1595_s6, %s1594_s12  }
  0x2f   : > { %295 = sbr.rel (%p1390_p3) target bundleno = 722 (0x2d2), region = 36  ;;  %s1426_s17 = sand.u32 (!%p1390_p3), 1, %s1244_s16  }
  0x30   : > { %s298_s0 = scalar_lea.sflag (!%p1390_p3), [#allocation6], %s1426_s17  ;;  %s300_s20 = scalar_lea.vmem (!%p1390_p3), [#allocation5], %s1426_s17 }
  0x34   : > { %1223 = dma.done.wait (%p1345_p8), %s298_s0, 16  }
  0x35   : > { %1225 = vsyncadd (%p1345_p8), %s298_s0, 4294967280  ;;  %s306_s19 = sand.u32 1, %s1325_s21   ;;  %s1436_s29 = sshll.u32 %s1426_s17, 5 }
  0x36   : > { %s307_s5 = scalar_lea.sflag [#allocation9], %s306_s19  ;;  %s310_s7 = scalar_lea.vmem [#allocation8], %s1436_s29 }
  0x37   : > { %1227 = dma.done.wait (%p1345_p8), %s307_s5, 1024  }
  0x38   : > { %1229 = vsyncadd (%p1345_p8), %s307_s5, 4294966272  ;;  %s320_s8 = scalar_lea.vmem [#allocation10], %s1436_s29  ;;  %s327_s9 = scalar_lea.sflag [#allocation12], %s1426_s17 }
  0x39   : > { %s1446_s24 = scalar_lea.vmem [#allocation11], %s1436_s29 }
  0x3a   : > { %1231 = dma.done.wait (%p1345_p8), %s327_s9, 512  }
  0x3b   : > { %1233 = vsyncadd (%p1345_p8), %s327_s9, 4294966784  ;;  %vm387_vm0 = vcmask 523264   ;;  %v397_v0 = vld [vmem:[%s320_s8 + $0x8] sm:$0xff]  ;;  %v399_v1 = vld [vmem:[%s320_s8 + $0x18] sm:$0xff]  ;;  %vm378_vm1 = vcmask 7168   ;;  %v1264_v8 = vmov -inf  }
  0x3c   : > { %917 = vmatpush.xpose.msk.msra.mxu0 %vm387_vm0, %v397_v0  ;;  %v396_v2 = vld [vmem:[%s320_s8] sm:$0xff]  ;;  %921 = vmatpush.xpose.msk.msra.mxu1 %vm387_vm0, %v399_v1  ;;  %v398_v3 = vld [vmem:[%s320_s8 + $0x10] sm:$0xff]  ;;  %v393_v6 = vld [vmem:[%s310_s7 + $0x8] sm:$0xff]  ;;  %379 = vst.msk [vmem:[#allocation2] sm:$0xff] %vm378_vm1, %v1264_v8  ;;  %vm491_vm2 = vcmask 130048   ;;  %v1265_v26 = vmov 0  }
  0x3d   : > { %v392_v4 = vld [vmem:[%s310_s7] sm:$0xff]  ;;  %v394_v5 = vld [vmem:[%s310_s7 + $0x10] sm:$0xff]  ;;  %v395_v7 = vld [vmem:[%s310_s7 + $0x18] sm:$0xff]  ;;  %380 = vst.msk [vmem:[#allocation2 + $0x8] sm:$0xff] %vm378_vm1, %v1264_v8  ;;  %1022 = vset.pattern.permute.xlu2 %v1265_v26  ;;  %1023 = vset.pattern.permute.xlu0 %v1265_v26  ;;  %v1266_v27 = vmov 0.0   ;;  %s369_s21 = scalar_lea.vmem [#allocation13], %s1436_s29 }
  0x3e   : > { %381 = vst.msk [vmem:[#allocation2 + $0x10] sm:$0xff] %vm378_vm1, %v1264_v8  ;;  %v1025_v9 = vld [vmem:[%s300_s20] ss:$0 sm:$0xff]  ;;  %1024 = vset.pattern.permute.xlu1 %v1265_v26  ;;  %v401_v44 = vld [vmem:[%s1446_s24 + $0x8] sm:$0xff]  ;;  %v400_v45 = vld [vmem:[%s1446_s24] sm:$0xff]  ;;  %s937_s27 = sshll.u32 %s1252_s18, 5 }
  0x3f   : > { %382 = vst.msk [vmem:[#allocation2 + $0x18] sm:$0xff] %vm378_vm1, %v1264_v8  ;;  %629 = vmatpush.msra.mxu2 %v401_v44  ;;  %v403_v46 = vld [vmem:[%s1446_s24 + $0x18] sm:$0xff]  ;;  %v402_v47 = vld [vmem:[%s1446_s24 + $0x10] sm:$0xff]  ;;  %s736_s13 = scalar_lea.hbm %s1569_s4, %s937_s27  ;;  %s737_s22 = sshll.u32 %s369_s21, 4  ;;  %s738_s22 = int_to_ptr.vmem [resolvable:$true] %s737_s22 }
  0x40   : > { %918 = vmatpush.xpose.msk.msra.mxu0 %vm387_vm0, %v396_v2  ;;  %922 = vmatpush.xpose.msk.msra.mxu1 %vm387_vm0, %v398_v3  ;;  %383 = vst.msk [vmem:[#allocation3] sm:$0xff] %vm378_vm1, %v1266_v27  ;;  %s739_s11 = sshll.u32 %s736_s13, 4  ;;  %s723_s12 = scalar_lea.sflag [#allocation7], %s1426_s17  ;;  %s740_s11 = int_to_ptr.hbm [resolvable:$true] %s739_s11 }
  0x41   : > { %384 = vst.msk [vmem:[#allocation3 + $0x8] sm:$0xff] %vm378_vm1, %v1266_v27  ;;  %630 = vmatpush.msra.mxu2 %v400_v45  ;;  %658 = vmatpush.msra.mxu3 %v403_v46  ;;  %s1184_s6 = sshra.s32 %s740_s11, 4  ;;  %s1190_s14 = scalar_lea.hbm %s1569_s4, 64  ;;  %s1185_s6 = int_to_ptr.hbm [resolvable:$true] %s1184_s6 }
  0x42   : > { %385 = vst.msk [vmem:[#allocation3 + $0x10] sm:$0xff] %vm378_vm1, %v1266_v27  ;;  %s1186_s1 = scalar_lea.hbm %s1185_s6, 32  ;;  %p1191_p7 = scmp.lt.s32.totalorder %s1185_s6, %s1569_s4 }
  0x43   : > { %919 = vmatmul.msk.f32.vlgmr.msra.gmra.mxu0 %vm387_vm0, %v392_v4  ;;  %923 = vmatmul.msk.f32.vlgmr.msra.gmra.mxu1 %vm387_vm0, %v394_v5  ;;  %386 = vst.msk [vmem:[#allocation3 + $0x18] sm:$0xff] %vm378_vm1, %v1266_v27  ;;  %v487_v28 = vld [vmem:[#allocation2] sm:$0xff]  ;;  %p1187_p4 = scmp.ne.s32.totalorder %s1185_s6, %s1186_s1  ;;  %p1192_p8 = scmp.lt.s32.totalorder %s1190_s14, %s1186_s1 }
  0x44   : > { %388 = vst.msk [vmem:[#allocation4] sm:$0xff] %vm387_vm0, %v1266_v27  ;;  %v1491_v33 = vld [vmem:[#allocation2 + $0x8] sm:$0xff]  ;;  %659 = vmatpush.msra.mxu3 %v402_v47 }
  0x45   : > { %389 = vst.msk [vmem:[#allocation4 + $0x8] sm:$0xff] %vm387_vm0, %v1266_v27  ;;  %v489_v32 = vld [vmem:[#allocation2 + $0x10] sm:$0xff]  ;;  %p1188_p5 = pnand %p1187_p4, %p1349_p9  ;;  %p1193_p10 = por %p1192_p8, %p1191_p7 }
  0x46   : > { %390 = vst.msk [vmem:[#allocation4 + $0x10] sm:$0xff] %vm387_vm0, %v1266_v27  ;;  %v490_v40 = vld [vmem:[#allocation2 + $0x18] sm:$0xff] }
  0x47   : > { %391 = vst.msk [vmem:[#allocation4 + $0x18] sm:$0xff] %vm387_vm0, %v1266_v27  ;;  %p1189_p6 = pneg %p1188_p5 }
  0x49   : > { %p1194_p13 = pnand %p1193_p10, %p1189_p6 }
  0x4a   : > { %v555_v45 = vld [vmem:[#allocation3 + $0x18] sm:$0xff] }
  0x4b   : > { %920 = vmatmul.msk.f32.gmra.mxu0 %vm387_vm0, %v393_v6  ;;  %924 = vmatmul.msk.f32.gmra.mxu1 %vm387_vm0, %v395_v7 }
  0xc0   : > { %v435_v10 = vpop.f32.mrf.mxu0  ;;  %v470_v12 = vpop.f32.mrf.mxu1 }
  0xc1   : > { %v476_v11 = vmul.f32 0.125, %v435_v10  ;;  %v478_v14 = vmul.f32 0.125, %v470_v12  ;;  %v552_v12 = vld [vmem:[#allocation3] sm:$0xff] }
  0xc3   : > { %v1466_v13 = vadd.f32 %v1025_v9, %v476_v11  ;;  %v1470_v16 = vadd.f32 %v1025_v9, %v478_v14 }
  0xc5   : > { %v492_v15 = vsel %vm491_vm2, %v1466_v13, -inf  ;;  %v498_v20 = vsel %vm491_vm2, %v1470_v16, -inf }
  0xc6   : > { %493 = vmax.xlane.f32.xlu0 %v492_v15 }
  0xc8   : > { %v438_v17 = vpop.f32.mrf.mxu0  ;;  %v473_v19 = vpop.f32.mrf.mxu1 }
  0xc9   : > { %v477_v18 = vmul.f32 0.125, %v438_v17  ;;  %v479_v22 = vmul.f32 0.125, %v473_v19 }
  0xcb   : > { %v1474_v21 = vadd.f32 %v1025_v9, %v477_v18  ;;  %v1478_v24 = vadd.f32 %v1025_v9, %v479_v22  ;;  %v581_v22 = vld [vmem:[#allocation4] sm:$0xff] }
  0xcd   : > { %v495_v23 = vsel %vm491_vm2, %v1474_v21, -inf  ;;  %v501_v25 = vsel %vm491_vm2, %v1478_v24, -inf }
  0xce   : > { %499 = vmax.xlane.f32.xlu0 %v498_v20  ;;  %496 = vmax.xlane.f32.xlu1 %v495_v23 }
  0xd6   : > { %502 = vmax.xlane.f32.xlu1 %v501_v25 }
 0x139   : > { %v494_v29 = vpop.xlane.xlu0 %493 }
 0x13a   : > { %v504_v30 = vmax.f32 %v487_v28, %v494_v29 }
 0x13c   : > { %v508_v31 = vsub.f32 %v487_v28, %v504_v30  ;;  %675 = vst.msk [vmem:[#allocation2] sm:$0xff] %vm378_vm1, %v504_v30  ;;  %522 = vperm.xlu2 %1022, %v504_v30   ;;  %v583_v28 = vld [vmem:[#allocation4 + $0x10] sm:$0xff] }
 0x13e   : > { %v512_v58 = vmul.f32 1.442695, %v508_v31 }
 0x141   : > { %v500_v34 = vpop.xlane.xlu0 %499  ;;  %v497_v35 = vpop.xlane.xlu1 %496 }
 0x142   : > { %v506_v36 = vmax.f32 %v489_v32, %v500_v34  ;;  %v505_v37 = vmax.f32 %v1491_v33, %v497_v35  ;;  %v553_v34 = vld [vmem:[#allocation3 + $0x8] sm:$0xff] }
 0x144   : > { %v510_v38 = vsub.f32 %v489_v32, %v506_v36  ;;  %677 = vst.msk [vmem:[#allocation2 + $0x10] sm:$0xff] %vm378_vm1, %v506_v36  ;;  %v509_v39 = vsub.f32 %v1491_v33, %v505_v37  ;;  %527 = vperm.xlu0 %1023, %v505_v37   ;;  %532 = vperm.xlu2 %1022, %v506_v36  }
 0x145   : > { %676 = vst.msk [vmem:[#allocation2 + $0x8] sm:$0xff] %vm378_vm1, %v505_v37 }
 0x146   : > { %v516_v61 = vmul.f32 1.442695, %v510_v38  ;;  %v514_v7 = vmul.f32 1.442695, %v509_v39 }
 0x149   : > { %v503_v41 = vpop.xlane.xlu1 %502 }
 0x14a   : > { %v507_v42 = vmax.f32 %v490_v40, %v503_v41 }
 0x14c   : > { %v511_v43 = vsub.f32 %v490_v40, %v507_v42  ;;  %678 = vst.msk [vmem:[#allocation2 + $0x18] sm:$0xff] %vm378_vm1, %v507_v42  ;;  %537 = vperm.xlu1 %1024, %v507_v42   ;;  %v582_v40 = vld [vmem:[#allocation4 + $0x8] sm:$0xff] }
 0x14e   : > { %v518_v10 = vmul.f32 1.442695, %v511_v43 }
 0x196   : > { %v523_v48 = vpop.permute.xlu2 %522 }
 0x197   : > { %v540_v49 = vsub.f32 %v1466_v13, %v523_v48 }
 0x199   : > { %v544_v50 = vmul.f32 1.442695, %v540_v49  ;;  %v584_v49 = vld [vmem:[#allocation4 + $0x18] sm:$0xff] }
 0x19b   : > { %1026 = vpow2.f32 %v544_v50 }
 0x19e   : > { %v533_v51 = vpop.permute.xlu2 %532 }
 0x19f   : > { %v542_v52 = vsub.f32 %v1470_v16, %v533_v51  ;;  %v554_v16 = vld [vmem:[#allocation3 + $0x10] sm:$0xff] }
 0x1a1   : > { %v1027_v53 = vpop.eup %1026  ;;  %v548_v54 = vmul.f32 1.442695, %v542_v52 }
 0x1a2   : > { %925 = vmatmul.msk.f32.vlgmr.msra.gmra.mxu2 %vm491_vm2, %v1027_v53  ;;  %v560_v55 = vsel %vm491_vm2, %v1027_v53, 0.0 }
 0x1a3   : > { %1028 = vpow2.f32 %v548_v54  ;;  %561 = vadd.xlane.f32.xlu2 %v560_v55 }
 0x1a4   : > { %1030 = vpow2.f32 %v512_v58 }
 0x1a9   : > { %v1029_v56 = vpop.eup %1028 }
 0x1aa   : > { %927 = vmatmul.msk.f32.vlgmr.msra.gmra.mxu3 %vm491_vm2, %v1029_v56  ;;  %v566_v57 = vsel %vm491_vm2, %v1029_v56, 0.0  ;;  %v1031_v63 = vpop.eup %1030 }
 0x1ab   : > { %567 = vadd.xlane.f32.xlu0 %v566_v57  ;;  %v556_v13 = vmul.f32 %v1031_v63, %v552_v12 }
 0x1b6   : > { %v528_v59 = vpop.permute.xlu0 %527 }
 0x1b7   : > { %v541_v60 = vsub.f32 %v1474_v21, %v528_v59 }
 0x1b9   : > { %v546_v62 = vmul.f32 1.442695, %v541_v60 }
 0x1bb   : > { %1032 = vpow2.f32 %v546_v62  ;;  %587 = vperm.xlu2 %1022, %v1031_v63  }
 0x1bc   : > { %1034 = vpow2.f32 %v516_v61 }
 0x1be   : > { %v538_v0 = vpop.permute.xlu1 %537 }
 0x1bf   : > { %v543_v1 = vsub.f32 %v1478_v24, %v538_v0 }
 0x1c1   : > { %v1033_v2 = vpop.eup %1032  ;;  %v550_v3 = vmul.f32 1.442695, %v543_v1 }
 0x1c2   : > { %v1035_v4 = vpop.eup %1034  ;;  %926 = vmatmul.msk.f32.gmra.mxu2 %vm491_vm2, %v1033_v2  ;;  %v563_v5 = vsel %vm491_vm2, %v1033_v2, 0.0 }
 0x1c3   : > { %1036 = vpow2.f32 %v550_v3  ;;  %564 = vadd.xlane.f32.xlu1 %v563_v5  ;;  %597 = vperm.xlu2 %1022, %v1035_v4   ;;  %v558_v17 = vmul.f32 %v1035_v4, %v554_v16 }
 0x1c4   : > { %1038 = vpow2.f32 %v514_v7 }
 0x1c5   : > { %1040 = vpow2.f32 %v518_v10 }
 0x1c9   : > { %v1037_v6 = vpop.eup %1036 }
 0x1ca   : > { %928 = vmatmul.msk.f32.gmra.mxu3 %vm491_vm2, %v1037_v6  ;;  %v1039_v8 = vpop.eup %1038  ;;  %v569_v9 = vsel %vm491_vm2, %v1037_v6, 0.0 }
 0x1cb   : > { %v1041_v11 = vpop.eup %1040  ;;  %v557_v35 = vmul.f32 %v1039_v8, %v553_v34 }
 0x1cc   : > { %v559_v46 = vmul.f32 %v1041_v11, %v555_v45 }
 0x1dc   : > { %592 = vperm.xlu1 %1024, %v1039_v8  }
 0x1ec   : > { %570 = vadd.xlane.f32.xlu2 %v569_v9 }
 0x204   : > { %602 = vperm.xlu2 %1022, %v1041_v11  }
 0x216   : > { %v562_v14 = vpop.xlane.xlu2 %561 }
 0x217   : > { %v572_v15 = vadd.f32 %v562_v14, %v556_v13 }
 0x219   : > { %577 = vst.msk [vmem:[#allocation3] sm:$0xff] %vm378_vm1, %v572_v15 }
 0x21e   : > { %v568_v18 = vpop.xlane.xlu0 %567  ;;  %v588_v20 = vpop.permute.xlu2 %587 }
 0x21f   : > { %v574_v19 = vadd.f32 %v568_v18, %v558_v17  ;;  %v605_v23 = vmul.f32 %v588_v20, %v581_v22 }
 0x220   : > { %v682_v21 = vld [vmem:[#allocation3] sm:$0xff] }
 0x221   : > { %579 = vst.msk [vmem:[#allocation3 + $0x10] sm:$0xff] %vm378_vm1, %v574_v19  ;;  %1042 = vrcp.f32 %v682_v21 }
 0x225   : > { %v632_v24 = vpop.f32.mrf.mxu2 }
 0x226   : > { %v667_v25 = vadd.f32 %v632_v24, %v605_v23  ;;  %v598_v29 = vpop.permute.xlu2 %597 }
 0x227   : > { %v1043_v26 = vpop.eup %1042  ;;  %v607_v30 = vmul.f32 %v598_v29, %v583_v28 }
 0x228   : > { %671 = vst.msk [vmem:[#allocation4] sm:$0xff] %vm387_vm0, %v667_v25  ;;  %696 = vperm.xlu0 %1023, %v1043_v26   ;;  %v684_v27 = vld [vmem:[#allocation3 + $0x10] sm:$0xff] }
 0x229   : > { %1044 = vrcp.f32 %v684_v27 }
 0x22d   : > { %v661_v31 = vpop.f32.mrf.mxu3 }
 0x22e   : > { %v669_v32 = vadd.f32 %v661_v31, %v607_v30 }
 0x22f   : > { %v1045_v33 = vpop.eup %1044  ;;  %v690_v56 = vld [vmem:[#allocation4] sm:$0xff] }
 0x230   : > { %673 = vst.msk [vmem:[#allocation4 + $0x10] sm:$0xff] %vm387_vm0, %v669_v32  ;;  %706 = vperm.xlu1 %1024, %v1045_v33  }
 0x236   : > { %v565_v36 = vpop.xlane.xlu1 %564 }
 0x237   : > { %v573_v37 = vadd.f32 %v565_v36, %v557_v35  ;;  %v692_v60 = vld [vmem:[#allocation4 + $0x10] sm:$0xff] }
 0x239   : > { %578 = vst.msk [vmem:[#allocation3 + $0x8] sm:$0xff] %vm378_vm1, %v573_v37 }
 0x240   : > { %v683_v38 = vld [vmem:[#allocation3 + $0x8] sm:$0xff] }
 0x241   : > { %1046 = vrcp.f32 %v683_v38 }
 0x245   : > { %v635_v43 = vpop.f32.mrf.mxu2 }
 0x247   : > { %v1047_v39 = vpop.eup %1046 }
 0x248   : > { %701 = vperm.xlu2 %1022, %v1047_v39  }
 0x24d   : > { %v664_v52 = vpop.f32.mrf.mxu3 }
 0x24e   : > { %v593_v41 = vpop.permute.xlu1 %592 }
 0x24f   : > { %v606_v42 = vmul.f32 %v593_v41, %v582_v40 }
 0x251   : > { %v668_v44 = vadd.f32 %v635_v43, %v606_v42 }
 0x253   : > { %672 = vst.msk [vmem:[#allocation4 + $0x8] sm:$0xff] %vm387_vm0, %v668_v44 }
 0x25a   : > { %v691_v61 = vld [vmem:[#allocation4 + $0x8] sm:$0xff] }
 0x25f   : > { %v571_v47 = vpop.xlane.xlu2 %570 }
 0x260   : > { %v575_v48 = vadd.f32 %v571_v47, %v559_v46 }
 0x262   : > { %580 = vst.msk [vmem:[#allocation3 + $0x18] sm:$0xff] %vm378_vm1, %v575_v48 }
 0x267   : > { %v603_v50 = vpop.permute.xlu2 %602 }
 0x268   : > { %v608_v51 = vmul.f32 %v603_v50, %v584_v49 }
 0x269   : > { %v685_v53 = vld [vmem:[#allocation3 + $0x18] sm:$0xff] }
 0x26a   : > { %v670_v54 = vadd.f32 %v664_v52, %v608_v51  ;;  %1048 = vrcp.f32 %v685_v53 }
 0x26c   : > { %674 = vst.msk [vmem:[#allocation4 + $0x18] sm:$0xff] %vm387_vm0, %v670_v54 }
 0x270   : > { %v1049_v55 = vpop.eup %1048 }
 0x271   : > { %711 = vperm.xlu2 %1022, %v1049_v55  }
 0x273   : > { %v693_v1 = vld [vmem:[#allocation4 + $0x18] sm:$0xff] }
 0x29a   : > { %v697_v57 = vpop.permute.xlu0 %696 }
 0x29b   : > { %v714_v58 = vmul.f32 %v697_v57, %v690_v56 }
 0x29d   : > { %718 = vst.msk [vmem:[%s369_s21] sm:$0xff] %vm387_vm0, %v714_v58 }
 0x2a2   : > { %v707_v59 = vpop.permute.xlu1 %706  ;;  %v702_v62 = vpop.permute.xlu2 %701 }
 0x2a3   : > { %v716_v63 = vmul.f32 %v707_v59, %v692_v60  ;;  %v715_v0 = vmul.f32 %v702_v62, %v691_v61 }
 0x2a5   : > { %720 = vst.msk [vmem:[%s369_s21 + $0x10] sm:$0xff] %vm387_vm0, %v716_v63 }
 0x2a6   : > { %719 = vst.msk [vmem:[%s369_s21 + $0x8] sm:$0xff] %vm387_vm0, %v715_v0 }
 0x2cb   : > { %v712_v2 = vpop.permute.xlu2 %711 }
 0x2cc   : > { %v717_v3 = vmul.f32 %v712_v2, %v693_v1 }
 0x2ce   : > { %721 = vst.msk [vmem:[%s369_s21 + $0x18] sm:$0xff] %vm387_vm0, %v717_v3 }
 0x2cf   : > { %1197 = shalt.err (!%p1194_p13)
}
 0x2d0   : > { %s1267_s17 = smov 128   ;;  %s1268_s20 = smov 8  }
 0x2d1   : > { %946 = dma.vmem_to_hbm [thread:$0]  (%p1349_p9), %s738_s22, 512, %s740_s11, %s723_s12, %s1267_s17, %s1267_s17, %s1268_s20  }
 0x2d2 PF: > { %s1596_s19 = sld [smem:[#allocation20_spill]]  ;;  %s754_s29 = sand.u32 1, %s1240_s15  }
 0x2d3   : > { %p962_p0 = pnand %p902_p12, %p1356_p11  ;;  %s755_s5 = scalar_lea.sflag [#allocation7], %s754_s29 }
 0x2d5   : > { %p963_p1 = pneg %p962_p0 }
 0x2d7   : > { %1235 = dma.done.wait (%p963_p1), %s755_s5, 512  }
 0x2d8   : > { %1237 = vsyncadd (%p963_p1), %s755_s5, 4294966784  ;;  %s26_s20 = sadd.s32 1, %s1596_s19   ;;  %s1597_s7 = sld [smem:[#allocation18_spill]] }
 0x2d9   : > { %p23_p2 = scmp.ge.s32.totalorder %s26_s20, 4   ;;  %s1598_s17 = sld [smem:[#allocation22_spill]] }
 0x2da   : > { %s1599_s18 = sld [smem:[#allocation19_spill]]  ;;  %s1601_s15 = smov %s1244_s16 }
 0x2db   : > { %s1600_s19 = sld [smem:[#allocation21_spill]]  ;;  %25 = sbr.rel (!%p23_p2) target bundleno = 13 (0xd), region = 126 }
 0x2de   : > { %s1602_s16 = smov %s1597_s7 }
 0x2e0   :  { %761 = vsyncpa [#allocation6], 1 }
 0x2e1   :  { %763 = vsyncpa [#allocation6 + $0x1], 1 }
 0x2e2   :  { %764 = vsyncpa [#allocation9], 1 }
 0x2e3   :  { %766 = vsyncpa [#allocation9 + $0x1], 1 }
 0x2e4   :  { %767 = vsyncpa [#allocation12], 1 }
 0x2e5   :  { %769 = vsyncpa [#allocation12 + $0x1], 1 }
 0x2e6   :  { %770 = vsyncpa [#allocation7], 1 }
 0x2e7   :  { %772 = vsyncpa [#allocation7 + $0x1], 1 }

</bundles_post_ra>
